<compile_context>
chip_gen: v6e
topology: v6e:2x2x1
jax: 0.10.0
libtpu: 0.0.40
codegen_flags: <defaults>
</compile_context>

<pallas_src>
import functools
import math

import jax
import jax.numpy as jnp
from jax import lax
from jax.experimental import pallas as pl
from jax.experimental.pallas import tpu as pltpu

EPS = 1e-10


def _compiler_params(block_bytes):
    # Raise the scoped VMEM limit when the per-step working set needs it.
    # Cap at 64 MiB: safe on v7x (64 MiB physical) and below physical on v5e/v6e.
    limit = int(min(max(2 * block_bytes + (8 << 20), 32 << 20), 64 << 20))
    return pltpu.CompilerParams(
        dimension_semantics=("parallel",),   # batch axis -> megacore sharding
        vmem_limit_bytes=limit,
    )


# ----------------------------------------------------------------------------
# Kernel 1 (fused): 2x GCN layers + masking + 'neibor' attention + mean pool
# ----------------------------------------------------------------------------
def _fused_kernel(adj_ref, xw1_ref, mcol_ref, mrow_ref, diag_ref, colsum_ref,
                  w2_ref, b1_ref, b2_ref, wb_ref, tau_ref,
                  hm_ref, att_ref, out_ref, *, matmul_dtype):
    f32 = jnp.float32
    Bt = adj_ref.shape[0]
    Dh = xw1_ref.shape[-1]

    adj = adj_ref[...].astype(matmul_dtype)                  # (Bt, N, N)
    mrow = mrow_ref[...]                                     # (Bt, 1, N)
    mcol = mcol_ref[...]                                     # (Bt, N, 1)

    # ---- GCN layer 1: relu(adj @ (X W1) + b1); X@W1 precomputed in wrapper.
    b1 = b1_ref[...].reshape(1, 1, Dh)
    h1 = jnp.einsum('bnm,bmd->bnd', adj, xw1_ref[...].astype(matmul_dtype),
                    preferred_element_type=f32) + b1
    h1 = jnp.maximum(h1, 0.0)

    # ---- GCN layer 2: relu((adj @ h1) @ W2 + b2)
    t = jnp.einsum('bnm,bmd->bnd', adj, h1.astype(matmul_dtype),
                   preferred_element_type=f32)
    w2b = jnp.broadcast_to(w2_ref[...].astype(matmul_dtype).reshape(1, Dh, Dh),
                           (Bt, Dh, Dh))
    b2 = b2_ref[...].reshape(1, 1, Dh)
    h2 = jnp.einsum('bnd,bde->bne', t.astype(matmul_dtype), w2b,
                    preferred_element_type=f32) + b2
    h2 = jnp.maximum(h2, 0.0)

    # hidden = mask.unsqueeze(2) * hidden
    hm = mcol * h2                                           # (Bt, N, Dh)
    hm_ref[...] = hm

    # ---- 'neibor' attention, kept lane-dense: att lives on lanes as (Bt,1,N).
    wbb = jnp.broadcast_to(wb_ref[...].reshape(1, 1, Dh), (Bt, 1, Dh))
    att_raw = jnp.einsum('bid,bnd->bin', wbb.astype(matmul_dtype),
                         hm.astype(matmul_dtype), preferred_element_type=f32)
    att_raw = att_raw + (mrow - 1.0) * 1e10
    att_max = jnp.max(att_raw, axis=2, keepdims=True)        # (Bt, 1, 1)
    tau = jnp.abs(tau_ref[0, 0])                             # scalar from SMEM
    att_e = jnp.exp((att_raw - att_max) * tau)               # (Bt, 1, N)

    # denom[b, n] = sum_j adj[b, n, j] * att_e[b, j]   (khop = 1)
    denom = jnp.einsum('bij,bnj->bin', att_e.astype(matmul_dtype), adj,
                       preferred_element_type=f32) + EPS
    att_b = att_e * diag_ref[...] * pl.reciprocal(denom, approx=True)
    # dnorm with adj_norm='none' -> scale by adj.sum(dim=1), then * mask
    att_b = att_b * colsum_ref[...] * mrow
    att_ref[...] = att_b                                     # (Bt, 1, N)

    # ---- mean pool of masked hidden: out = sum_n hm / (eps + sum(mask))
    pooled = jnp.einsum('bin,bnd->bid', mrow.astype(matmul_dtype),
                        h2.astype(matmul_dtype), preferred_element_type=f32)
    nvalid = jnp.sum(mrow, axis=2, keepdims=True)            # (Bt, 1, 1)
    out_ref[...] = pooled * pl.reciprocal(EPS + nvalid, approx=True)


def fused_gcn_att(adj, xw1, mask_col, mask_row, diag_row, colsum_row,
                  w2, b1, b2, wb_row, tau, *, block_b=1,
                  matmul_dtype=jnp.float32):
    B, N, _ = adj.shape
    Dh = xw1.shape[-1]
    if B % block_b != 0:
        block_b = 1
    Bt = block_b
    kernel = functools.partial(_fused_kernel, matmul_dtype=matmul_dtype)
    blk_bytes = 4 * (Bt * N * N + 2 * Bt * N * Dh + 5 * Bt * N
                     + Dh * Dh + 4 * Dh + Bt * Dh)
    return pl.pallas_call(
        kernel,
        out_shape=(
            jax.ShapeDtypeStruct((B, N, Dh), jnp.float32),   # masked hidden
            jax.ShapeDtypeStruct((B, 1, N), jnp.float32),    # att (lane-dense)
            jax.ShapeDtypeStruct((B, 1, Dh), jnp.float32),   # pooled out
        ),
        grid=(B // Bt,),
        in_specs=[
            pl.BlockSpec((Bt, N, N), lambda i: (i, 0, 0)),
            pl.BlockSpec((Bt, N, Dh), lambda i: (i, 0, 0)),
            pl.BlockSpec((Bt, N, 1), lambda i: (i, 0, 0)),
            pl.BlockSpec((Bt, 1, N), lambda i: (i, 0, 0)),
            pl.BlockSpec((Bt, 1, N), lambda i: (i, 0, 0)),
            pl.BlockSpec((Bt, 1, N), lambda i: (i, 0, 0)),
            pl.BlockSpec((Dh, Dh), lambda i: (0, 0)),
            pl.BlockSpec((1, Dh), lambda i: (0, 0)),
            pl.BlockSpec((1, Dh), lambda i: (0, 0)),
            pl.BlockSpec((1, Dh), lambda i: (0, 0)),
            pl.BlockSpec(memory_space=pltpu.MemorySpace.SMEM),   # tau scalar
        ],
        out_specs=(
            pl.BlockSpec((Bt, N, Dh), lambda i: (i, 0, 0)),
            pl.BlockSpec((Bt, 1, N), lambda i: (i, 0, 0)),
            pl.BlockSpec((Bt, 1, Dh), lambda i: (i, 0, 0)),
        ),
        compiler_params=_compiler_params(blk_bytes),
    )(adj, xw1, mask_col, mask_row, diag_row, colsum_row, w2, b1, b2, wb_row, tau)


# ----------------------------------------------------------------------------
# Kernel 2: in-kernel assign_m gather (one-hot @ adj), normalization,
#           H = assign_m @ (att*hidden),  new_adj = assign_m @ adj @ assign_m^T
# ----------------------------------------------------------------------------
def _pool_kernel(adj_ref, hm_ref, att_ref, idx_ref, nmask_ref,
                 h_ref, newadj_ref, *, matmul_dtype):
    f32 = jnp.float32
    Bt, _, N = adj_ref.shape
    K = idx_ref.shape[1]

    adj = adj_ref[...].astype(matmul_dtype)                  # (Bt, N, N)
    hm = hm_ref[...]                                         # (Bt, N, D)
    att = att_ref[...]                                       # (Bt, 1, N)
    idx = idx_ref[...]                                       # (Bt, K, 1) int32
    nm = nmask_ref[...]                                      # (Bt, K, 1)

    # Gather adj rows via one-hot selection against the VMEM-resident adj block
    # (avoids an extra HBM pass over adj and a (B,K,N) HBM intermediate).
    lanes = lax.broadcasted_iota(jnp.int32, (Bt, K, N), 2)
    sel = jnp.where(lanes == idx, 1.0, 0.0) * nm             # (Bt, K, N)
    assign_raw = jnp.einsum('bkn,bnm->bkm', sel.astype(matmul_dtype), adj,
                            preferred_element_type=f32)      # rows of adj (or 0)
    colsum = jnp.sum(assign_raw, axis=1, keepdims=True)      # sum over K (dim=1)
    a_norm = assign_raw * pl.reciprocal(colsum + EPS, approx=True)

    # H = assign_m @ Z with Z = att*hidden  ==  (assign_m * att_row) @ hidden,
    # so Z never round-trips through HBM.
    h_ref[...] = jnp.einsum('bkn,bnd->bkd', (a_norm * att).astype(matmul_dtype),
                            hm.astype(matmul_dtype), preferred_element_type=f32)

    tmp = jnp.einsum('bkn,bnm->bkm', a_norm.astype(matmul_dtype), adj,
                     preferred_element_type=f32)             # (Bt, K, N)
    # new_adj = tmp @ a_norm^T (contract on the node axis of both operands).
    newadj_ref[...] = jnp.einsum('bkm,bjm->bkj', tmp.astype(matmul_dtype),
                                 a_norm.astype(matmul_dtype),
                                 preferred_element_type=f32)


def pool_forward(adj, hm, att_row, top_index_col, new_mask_col, *, block_b=1,
                 matmul_dtype=jnp.float32):
    B, N, _ = adj.shape
    D = hm.shape[-1]
    K = top_index_col.shape[1]
    if B % block_b != 0:
        block_b = 1
    Bt = block_b
    kernel = functools.partial(_pool_kernel, matmul_dtype=matmul_dtype)
    blk_bytes = 4 * (Bt * N * N + Bt * N * D + Bt * N + 2 * Bt * K
                     + Bt * K * D + Bt * K * K + 2 * Bt * K * N)
    return pl.pallas_call(
        kernel,
        out_shape=(
            jax.ShapeDtypeStruct((B, K, D), jnp.float32),    # H
            jax.ShapeDtypeStruct((B, K, K), jnp.float32),    # new_adj
        ),
        grid=(B // Bt,),
        in_specs=[
            pl.BlockSpec((Bt, N, N), lambda i: (i, 0, 0)),
            pl.BlockSpec((Bt, N, D), lambda i: (i, 0, 0)),
            pl.BlockSpec((Bt, 1, N), lambda i: (i, 0, 0)),
            pl.BlockSpec((Bt, K, 1), lambda i: (i, 0, 0)),
            pl.BlockSpec((Bt, K, 1), lambda i: (i, 0, 0)),
        ],
        out_specs=(
            pl.BlockSpec((Bt, K, D), lambda i: (i, 0, 0)),
            pl.BlockSpec((Bt, K, K), lambda i: (i, 0, 0)),
        ),
        compiler_params=_compiler_params(blk_bytes),
    )(adj, hm, att_row, top_index_col, new_mask_col)


# ----------------------------------------------------------------------------
# AGCNBlock forward (glue in plain JAX, hot paths in the two fused kernels)
# ----------------------------------------------------------------------------
def agcn_forward(X, adj, mask, params, sample_key, filt_percent=0.7,
                 block_b=1, matmul_dtype=jnp.float32):
    X = X.astype(jnp.float32)
    adj = adj.astype(jnp.float32)
    mask = mask.astype(jnp.float32)
    B, N, Din = X.shape
    Dh = params["w1"].shape[1]

    # Hoisted, cheap precomputation (flattened first matmul; diag/colsum rows).
    xw1 = (X.reshape(B * N, Din) @ params["w1"]).reshape(B, N, Dh)
    mask_col = mask[:, :, None]                              # (B, N, 1)
    mask_row = mask[:, None, :]                              # (B, 1, N)
    diag_row = jnp.diagonal(adj, axis1=1, axis2=2)[:, None, :]        # (B, 1, N)
    colsum_row = jnp.sum(adj, axis=1)[:, None, :]                     # (B, 1, N)
    wb_row = params["w_b"].reshape(1, Dh)

    hm, att_row, out_row = fused_gcn_att(
        adj, xw1, mask_col, mask_row, diag_row, colsum_row,
        params["w2"], params["b1"], params["b2"], wb_row, params["tau"],
        block_b=block_b, matmul_dtype=matmul_dtype)
    att = att_row[:, 0, :]                                   # (B, N)
    out = out_row[:, 0, :]                                   # (B, Dh)

    k_max = int(math.ceil(filt_percent * N))
    k_list = jnp.ceil(filt_percent * jnp.sum(mask, axis=1)).astype(jnp.int32)
    new_mask = (jnp.arange(k_max)[None, :] < k_list[:, None]).astype(jnp.float32)

    # sort == 'sample': sample k_max node indices proportionally to att.
    # TODO(synk): original uses host-side np.random.choice (with replacement);
    # same distribution here via jax.random.categorical, but the RNG stream differs.
    att_samp = att * mask
    att_samp = att_samp / (jnp.sum(att_samp, axis=1, keepdims=True) + EPS)
    logits = jnp.log(att_samp + 1e-30)
    top_index = jax.random.categorical(
        sample_key, jnp.broadcast_to(logits[:, None, :], (B, k_max, N)),
        axis=-1).astype(jnp.int32)                           # (B, k_max)

    H, new_adj = pool_forward(adj, hm, att_row, top_index[:, :, None],
                              new_mask[:, :, None], block_b=block_b,
                              matmul_dtype=matmul_dtype)
    visualize_tools = []
    return out, H, new_adj, new_mask, visualize_tools


# jit the whole forward so the wrapper glue fuses into one XLA program.
agcn_forward_jit = jax.jit(
    agcn_forward, static_argnames=("filt_percent", "block_b", "matmul_dtype"))


# ----------------------------------------------------------------------------
# Deterministic parameter init (matches AGCNBlock.__init__ shapes)
# ----------------------------------------------------------------------------
def make_params(key, input_dim, hidden_dim):
    k1, k2, k3, k4 = jax.random.split(key, 4)

    def xavier_normal(k, shape):
        fan_in, fan_out = shape
        std = math.sqrt(2.0 / (fan_in + fan_out))
        return (std * jax.random.normal(k, shape)).astype(jnp.float32)

    return {
        "w1": xavier_normal(k1, (input_dim, hidden_dim)),
        "b1": jnp.zeros((1, hidden_dim), jnp.float32),
        "w2": xavier_normal(k2, (hidden_dim, hidden_dim)),
        "b2": jnp.zeros((1, hidden_dim), jnp.float32),
        # w_a only used for model='unet' / softmax='global'; kept for shape parity
        "w_a": jax.random.normal(k3, (1, hidden_dim, 1)).astype(jnp.float32),
        "w_b": jax.random.uniform(k4, (1, hidden_dim, 1), jnp.float32, -1.0, 1.0),
        "tau": jnp.ones((1, 1), jnp.float32),
        "lamda1": jnp.ones((), jnp.float32),   # unused (softmax='neibor')
        "lamda2": jnp.ones((), jnp.float32),   # unused
    }


if __name__ == "__main__":
    B, N, INPUT_DIM, HIDDEN_DIM = 2, 16, 8, 32

    key = jax.random.PRNGKey(0)
    kx, kadj, kparam, ksamp = jax.random.split(key, 4)

    X = jax.random.normal(kx, (B, N, INPUT_DIM)).astype(jnp.float32)

    # mask: batch 0 has 16 valid nodes, batch 1 has 12
    valid = jnp.array([16, 12], dtype=jnp.int32)
    mask = (jnp.arange(N)[None, :] < valid[:, None]).astype(jnp.float32)

    # non-negative symmetric adjacency with self loops, zeroed for masked nodes
    a = jax.random.uniform(kadj, (B, N, N), jnp.float32)
    adj = 0.5 * (a + jnp.swapaxes(a, 1, 2)) + jnp.eye(N, dtype=jnp.float32)[None]
    adj = adj * mask[:, :, None] * mask[:, None, :]

    params = make_params(kparam, INPUT_DIM, HIDDEN_DIM)

    out, H, new_adj, new_mask, _ = agcn_forward_jit(X, adj, mask, params, ksamp,
                                                    block_b=1)
    jax.block_until_ready((out, H, new_adj, new_mask))

    k_max = int(math.ceil(0.7 * N))
    assert out.shape == (B, HIDDEN_DIM)
    assert H.shape == (B, k_max, HIDDEN_DIM)
    assert new_adj.shape == (B, k_max, k_max)
    assert new_mask.shape == (B, k_max)
    assert bool(jnp.all(jnp.isfinite(out)))
    assert bool(jnp.all(jnp.isfinite(H)))
    assert bool(jnp.all(jnp.isfinite(new_adj)))
    print("KERNEL_OK")
</pallas_src>

<mosaic_0001>
module attributes {stable_mosaic.version = 11 : i64} {
  func.func @_fused_kernel(%arg0: i32, %arg1: memref<1x16x16xf32, #tpu.memory_space<vmem>>, %arg2: memref<1x16x32xf32, #tpu.memory_space<vmem>>, %arg3: memref<1x16x1xf32, #tpu.memory_space<vmem>>, %arg4: memref<1x1x16xf32, #tpu.memory_space<vmem>>, %arg5: memref<1x1x16xf32, #tpu.memory_space<vmem>>, %arg6: memref<1x1x16xf32, #tpu.memory_space<vmem>>, %arg7: memref<32x32xf32, #tpu.memory_space<vmem>>, %arg8: memref<1x32xf32, #tpu.memory_space<vmem>>, %arg9: memref<1x32xf32, #tpu.memory_space<vmem>>, %arg10: memref<1x32xf32, #tpu.memory_space<vmem>>, %arg11: memref<1x1xf32, #tpu.memory_space<smem>>, %arg12: memref<1x16x32xf32, #tpu.memory_space<vmem>>, %arg13: memref<1x1x16xf32, #tpu.memory_space<vmem>>, %arg14: memref<1x1x32xf32, #tpu.memory_space<vmem>>) attributes {dimension_semantics = [#tpu.dimension_semantics<parallel>], iteration_bounds = array<i64: 2>, scalar_prefetch = 0 : i64, scratch_operands = 0 : i64, tpu.core_type = #tpu.core_type<tc>, window_params = [{transform_indices = @transform_0, window_bounds = array<i64: 1, 16, 16>}, {transform_indices = @transform_1, window_bounds = array<i64: 1, 16, 32>}, {transform_indices = @transform_2, window_bounds = array<i64: 1, 16, 1>}, {transform_indices = @transform_3, window_bounds = array<i64: 1, 1, 16>}, {transform_indices = @transform_4, window_bounds = array<i64: 1, 1, 16>}, {transform_indices = @transform_5, window_bounds = array<i64: 1, 1, 16>}, {pipeline_mode = #tpu.pipeline_mode<synchronous>, transform_indices = @transform_6, window_bounds = array<i64: 32, 32>}, {pipeline_mode = #tpu.pipeline_mode<synchronous>, transform_indices = @transform_7, window_bounds = array<i64: 1, 32>}, {pipeline_mode = #tpu.pipeline_mode<synchronous>, transform_indices = @transform_8, window_bounds = array<i64: 1, 32>}, {pipeline_mode = #tpu.pipeline_mode<synchronous>, transform_indices = @transform_9, window_bounds = array<i64: 1, 32>}, {transform_indices = @transform_10, window_bounds = array<i64: 1, 1>}, {transform_indices = @transform_11, window_bounds = array<i64: 1, 16, 32>}, {transform_indices = @transform_12, window_bounds = array<i64: 1, 1, 16>}, {transform_indices = @transform_13, window_bounds = array<i64: 1, 1, 32>}]} {
    %c0 = arith.constant 0 : index
    %c0_0 = arith.constant 0 : index
    %c0_1 = arith.constant 0 : index
    %0 = vector.load %arg1[%c0, %c0_0, %c0_1] : memref<1x16x16xf32, #tpu.memory_space<vmem>>, vector<1x16x16xf32>
    %c0_2 = arith.constant 0 : index
    %c0_3 = arith.constant 0 : index
    %c0_4 = arith.constant 0 : index
    %1 = vector.load %arg4[%c0_2, %c0_3, %c0_4] : memref<1x1x16xf32, #tpu.memory_space<vmem>>, vector<1x1x16xf32>
    %c0_5 = arith.constant 0 : index
    %c0_6 = arith.constant 0 : index
    %c0_7 = arith.constant 0 : index
    %2 = vector.load %arg3[%c0_5, %c0_6, %c0_7] : memref<1x16x1xf32, #tpu.memory_space<vmem>>, vector<1x16x1xf32>
    %c0_8 = arith.constant 0 : index
    %c0_9 = arith.constant 0 : index
    %3 = vector.load %arg8[%c0_8, %c0_9] : memref<1x32xf32, #tpu.memory_space<vmem>>, vector<1x32xf32>
    %4 = vector.shape_cast %3 : vector<1x32xf32> to vector<1x1x32xf32>
    %c0_10 = arith.constant 0 : index
    %c0_11 = arith.constant 0 : index
    %c0_12 = arith.constant 0 : index
    %5 = vector.load %arg2[%c0_10, %c0_11, %c0_12] : memref<1x16x32xf32, #tpu.memory_space<vmem>>, vector<1x16x32xf32>
    "tpu.trace_start"() <{level = 10 : i32, message = "bnm,bmd->bnd"}> : () -> ()
    %cst = arith.constant dense<0.000000e+00> : vector<1x16x32xf32>
    %6 = tpu.matmul %0, %5, %cst {dimension_numbers = #tpu.dot_dimension_numbers<[2], [1], [1], [2], [0, 0, 0, 1, 1, 2], [0], [0]>} : vector<1x16x16xf32>, vector<1x16x32xf32>, vector<1x16x32xf32> -> vector<1x16x32xf32>
    "tpu.trace_stop"() : () -> ()
    %7 = vector.broadcast %4 : vector<1x1x32xf32> to vector<1x16x32xf32>
    %8 = arith.addf %6, %7 : vector<1x16x32xf32>
    %cst_13 = arith.constant 0.000000e+00 : f32
    %9 = vector.broadcast %cst_13 : f32 to vector<1x16x32xf32>
    %10 = arith.maximumf %8, %9 : vector<1x16x32xf32>
    "tpu.trace_start"() <{level = 10 : i32, message = "bnm,bmd->bnd"}> : () -> ()
    %cst_14 = arith.constant dense<0.000000e+00> : vector<1x16x32xf32>
    %11 = tpu.matmul %0, %10, %cst_14 {dimension_numbers = #tpu.dot_dimension_numbers<[2], [1], [1], [2], [0, 0, 0, 1, 1, 2], [0], [0]>} : vector<1x16x16xf32>, vector<1x16x32xf32>, vector<1x16x32xf32> -> vector<1x16x32xf32>
    "tpu.trace_stop"() : () -> ()
    %c0_15 = arith.constant 0 : index
    %c0_16 = arith.constant 0 : index
    %12 = vector.load %arg7[%c0_15, %c0_16] : memref<32x32xf32, #tpu.memory_space<vmem>>, vector<32x32xf32>
    %13 = vector.shape_cast %12 : vector<32x32xf32> to vector<1x32x32xf32>
    %c0_17 = arith.constant 0 : index
    %c0_18 = arith.constant 0 : index
    %14 = vector.load %arg9[%c0_17, %c0_18] : memref<1x32xf32, #tpu.memory_space<vmem>>, vector<1x32xf32>
    %15 = vector.shape_cast %14 : vector<1x32xf32> to vector<1x1x32xf32>
    "tpu.trace_start"() <{level = 10 : i32, message = "bnd,bde->bne"}> : () -> ()
    %cst_19 = arith.constant dense<0.000000e+00> : vector<1x16x32xf32>
    %16 = tpu.matmul %11, %13, %cst_19 {dimension_numbers = #tpu.dot_dimension_numbers<[2], [1], [1], [2], [0, 0, 0, 1, 1, 2], [0], [0]>} : vector<1x16x32xf32>, vector<1x32x32xf32>, vector<1x16x32xf32> -> vector<1x16x32xf32>
    "tpu.trace_stop"() : () -> ()
    %17 = vector.broadcast %15 : vector<1x1x32xf32> to vector<1x16x32xf32>
    %18 = arith.addf %16, %17 : vector<1x16x32xf32>
    %cst_20 = arith.constant 0.000000e+00 : f32
    %19 = vector.broadcast %cst_20 : f32 to vector<1x16x32xf32>
    %20 = arith.maximumf %18, %19 : vector<1x16x32xf32>
    %21 = vector.broadcast %2 : vector<1x16x1xf32> to vector<1x16x32xf32>
    %22 = arith.mulf %21, %20 : vector<1x16x32xf32>
    %c0_21 = arith.constant 0 : index
    %c0_22 = arith.constant 0 : index
    %c0_23 = arith.constant 0 : index
    %23 = vector.load %arg12[%c0_21, %c0_22, %c0_23] : memref<1x16x32xf32, #tpu.memory_space<vmem>>, vector<1x16x32xf32>
    tpu.vector_store %arg12[%c0_21, %c0_22, %c0_23], %22 {strides = array<i32>} : memref<1x16x32xf32, #tpu.memory_space<vmem>>, vector<1x16x32xf32>,
    %c0_24 = arith.constant 0 : index
    %c0_25 = arith.constant 0 : index
    %24 = vector.load %arg10[%c0_24, %c0_25] : memref<1x32xf32, #tpu.memory_space<vmem>>, vector<1x32xf32>
    %25 = vector.shape_cast %24 : vector<1x32xf32> to vector<1x1x32xf32>
    "tpu.trace_start"() <{level = 10 : i32, message = "bid,bnd->bin"}> : () -> ()
    %cst_26 = arith.constant dense<0.000000e+00> : vector<1x1x16xf32>
    %26 = tpu.matmul %25, %22, %cst_26 {dimension_numbers = #tpu.dot_dimension_numbers<[2], [2], [1], [1], [0, 0, 0, 1, 1, 1], [0], [0]>} : vector<1x1x32xf32>, vector<1x16x32xf32>, vector<1x1x16xf32> -> vector<1x1x16xf32>
    "tpu.trace_stop"() : () -> ()
    %cst_27 = arith.constant 1.000000e+00 : f32
    %27 = vector.broadcast %cst_27 : f32 to vector<1x1x16xf32>
    %28 = arith.subf %1, %27 : vector<1x1x16xf32>
    %cst_28 = arith.constant 1.000000e+10 : f32
    %29 = vector.broadcast %cst_28 : f32 to vector<1x1x16xf32>
    %30 = arith.mulf %28, %29 : vector<1x1x16xf32>
    %31 = arith.addf %26, %30 : vector<1x1x16xf32>
    %cst_29 = arith.constant dense<0xFF800000> : vector<1x1xf32>
    %32 = vector.multi_reduction <maximumf>, %31, %cst_29 [2] : vector<1x1x16xf32> to vector<1x1xf32>
    %33 = vector.shape_cast %32 : vector<1x1xf32> to vector<1x1x1xf32>
    %c0_30 = arith.constant 0 : index
    %c0_31 = arith.constant 0 : index
    %34 = memref.load %arg11[%c0_30, %c0_31] : memref<1x1xf32, #tpu.memory_space<smem>>
    %35 = math.absf %34 : f32
    %36 = vector.broadcast %33 : vector<1x1x1xf32> to vector<1x1x16xf32>
    %37 = arith.subf %31, %36 : vector<1x1x16xf32>
    %38 = vector.broadcast %35 : f32 to vector<1x1x16xf32>
    %39 = arith.mulf %37, %38 : vector<1x1x16xf32>
    %40 = math.exp %39 : vector<1x1x16xf32>
    "tpu.trace_start"() <{level = 10 : i32, message = "bij,bnj->bin"}> : () -> ()
    %cst_32 = arith.constant dense<0.000000e+00> : vector<1x1x16xf32>
    %41 = tpu.matmul %40, %0, %cst_32 {dimension_numbers = #tpu.dot_dimension_numbers<[2], [2], [1], [1], [0, 0, 0, 1, 1, 1], [0], [0]>} : vector<1x1x16xf32>, vector<1x16x16xf32>, vector<1x1x16xf32> -> vector<1x1x16xf32>
    "tpu.trace_stop"() : () -> ()
    %cst_33 = arith.constant 1.000000e-10 : f32
    %42 = vector.broadcast %cst_33 : f32 to vector<1x1x16xf32>
    %43 = arith.addf %41, %42 : vector<1x1x16xf32>
    %c0_34 = arith.constant 0 : index
    %c0_35 = arith.constant 0 : index
    %c0_36 = arith.constant 0 : index
    %44 = vector.load %arg5[%c0_34, %c0_35, %c0_36] : memref<1x1x16xf32, #tpu.memory_space<vmem>>, vector<1x1x16xf32>
    %45 = arith.mulf %40, %44 : vector<1x1x16xf32>
    %46 = tpu.reciprocal %43 {approx = true} : vector<1x1x16xf32> -> vector<1x1x16xf32>
    %47 = arith.mulf %45, %46 : vector<1x1x16xf32>
    %c0_37 = arith.constant 0 : index
    %c0_38 = arith.constant 0 : index
    %c0_39 = arith.constant 0 : index
    %48 = vector.load %arg6[%c0_37, %c0_38, %c0_39] : memref<1x1x16xf32, #tpu.memory_space<vmem>>, vector<1x1x16xf32>
    %49 = arith.mulf %47, %48 : vector<1x1x16xf32>
    %50 = arith.mulf %49, %1 : vector<1x1x16xf32>
    %c0_40 = arith.constant 0 : index
    %c0_41 = arith.constant 0 : index
    %c0_42 = arith.constant 0 : index
    %51 = vector.load %arg13[%c0_40, %c0_41, %c0_42] : memref<1x1x16xf32, #tpu.memory_space<vmem>>, vector<1x1x16xf32>
    tpu.vector_store %arg13[%c0_40, %c0_41, %c0_42], %50 {strides = array<i32>} : memref<1x1x16xf32, #tpu.memory_space<vmem>>, vector<1x1x16xf32>,
    "tpu.trace_start"() <{level = 10 : i32, message = "bin,bnd->bid"}> : () -> ()
    %cst_43 = arith.constant dense<0.000000e+00> : vector<1x1x32xf32>
    %52 = tpu.matmul %1, %20, %cst_43 {dimension_numbers = #tpu.dot_dimension_numbers<[2], [1], [1], [2], [0, 0, 0, 1, 1, 2], [0], [0]>} : vector<1x1x16xf32>, vector<1x16x32xf32>, vector<1x1x32xf32> -> vector<1x1x32xf32>
    "tpu.trace_stop"() : () -> ()
    %cst_44 = arith.constant dense<0.000000e+00> : vector<1x1xf32>
    %53 = vector.multi_reduction <add>, %1, %cst_44 [2] : vector<1x1x16xf32> to vector<1x1xf32>
    %54 = vector.shape_cast %53 : vector<1x1xf32> to vector<1x1x1xf32>
    %cst_45 = arith.constant 1.000000e-10 : f32
    %55 = vector.broadcast %cst_45 : f32 to vector<1x1x1xf32>
    %56 = arith.addf %55, %54 : vector<1x1x1xf32>
    %57 = tpu.reciprocal %56 {approx = true} : vector<1x1x1xf32> -> vector<1x1x1xf32>
    %58 = vector.broadcast %57 : vector<1x1x1xf32> to vector<1x1x32xf32>
    %59 = arith.mulf %52, %58 : vector<1x1x32xf32>
    %c0_46 = arith.constant 0 : index
    %c0_47 = arith.constant 0 : index
    %c0_48 = arith.constant 0 : index
    %60 = vector.load %arg14[%c0_46, %c0_47, %c0_48] : memref<1x1x32xf32, #tpu.memory_space<vmem>>, vector<1x1x32xf32>
    tpu.vector_store %arg14[%c0_46, %c0_47, %c0_48], %59 {strides = array<i32>} : memref<1x1x32xf32, #tpu.memory_space<vmem>>, vector<1x1x32xf32>,
    return
  }
  func.func @transform_0(%arg0: i32) -> (i32, i32, i32) {
    %c0_i32 = arith.constant 0 : i32
    %c0_i32_0 = arith.constant 0 : i32
    %c0_i32_1 = arith.constant 0 : i32
    return %arg0, %c0_i32, %c0_i32_0 : i32, i32, i32
  }
  func.func @transform_1(%arg0: i32) -> (i32, i32, i32) {
    %c0_i32 = arith.constant 0 : i32
    %c0_i32_0 = arith.constant 0 : i32
    %c0_i32_1 = arith.constant 0 : i32
    return %arg0, %c0_i32, %c0_i32_0 : i32, i32, i32
  }
  func.func @transform_2(%arg0: i32) -> (i32, i32, i32) {
    %c0_i32 = arith.constant 0 : i32
    %c0_i32_0 = arith.constant 0 : i32
    %c0_i32_1 = arith.constant 0 : i32
    return %arg0, %c0_i32, %c0_i32_0 : i32, i32, i32
  }
  func.func @transform_3(%arg0: i32) -> (i32, i32, i32) {
    %c0_i32 = arith.constant 0 : i32
    %c0_i32_0 = arith.constant 0 : i32
    %c0_i32_1 = arith.constant 0 : i32
    return %arg0, %c0_i32, %c0_i32_0 : i32, i32, i32
  }
  func.func @transform_4(%arg0: i32) -> (i32, i32, i32) {
    %c0_i32 = arith.constant 0 : i32
    %c0_i32_0 = arith.constant 0 : i32
    %c0_i32_1 = arith.constant 0 : i32
    return %arg0, %c0_i32, %c0_i32_0 : i32, i32, i32
  }
  func.func @transform_5(%arg0: i32) -> (i32, i32, i32) {
    %c0_i32 = arith.constant 0 : i32
    %c0_i32_0 = arith.constant 0 : i32
    %c0_i32_1 = arith.constant 0 : i32
    return %arg0, %c0_i32, %c0_i32_0 : i32, i32, i32
  }
  func.func @transform_6(%arg0: i32) -> (i32, i32) {
    %c0_i32 = arith.constant 0 : i32
    %c0_i32_0 = arith.constant 0 : i32
    %c0_i32_1 = arith.constant 0 : i32
    return %c0_i32, %c0_i32_0 : i32, i32
  }
  func.func @transform_7(%arg0: i32) -> (i32, i32) {
    %c0_i32 = arith.constant 0 : i32
    %c0_i32_0 = arith.constant 0 : i32
    %c0_i32_1 = arith.constant 0 : i32
    return %c0_i32, %c0_i32_0 : i32, i32
  }
  func.func @transform_8(%arg0: i32) -> (i32, i32) {
    %c0_i32 = arith.constant 0 : i32
    %c0_i32_0 = arith.constant 0 : i32
    %c0_i32_1 = arith.constant 0 : i32
    return %c0_i32, %c0_i32_0 : i32, i32
  }
  func.func @transform_9(%arg0: i32) -> (i32, i32) {
    %c0_i32 = arith.constant 0 : i32
    %c0_i32_0 = arith.constant 0 : i32
    %c0_i32_1 = arith.constant 0 : i32
    return %c0_i32, %c0_i32_0 : i32, i32
  }
  func.func @transform_10(%arg0: i32) -> (i32, i32) {
    %c0_i32 = arith.constant 0 : i32
    %c0_i32_0 = arith.constant 0 : i32
    %c0_i32_1 = arith.constant 0 : i32
    return %c0_i32, %c0_i32_0 : i32, i32
  }
  func.func @transform_11(%arg0: i32) -> (i32, i32, i32) {
    %c0_i32 = arith.constant 0 : i32
    %c0_i32_0 = arith.constant 0 : i32
    %c0_i32_1 = arith.constant 0 : i32
    return %arg0, %c0_i32, %c0_i32_0 : i32, i32, i32
  }
  func.func @transform_12(%arg0: i32) -> (i32, i32, i32) {
    %c0_i32 = arith.constant 0 : i32
    %c0_i32_0 = arith.constant 0 : i32
    %c0_i32_1 = arith.constant 0 : i32
    return %arg0, %c0_i32, %c0_i32_0 : i32, i32, i32
  }
  func.func @transform_13(%arg0: i32) -> (i32, i32, i32) {
    %c0_i32 = arith.constant 0 : i32
    %c0_i32_0 = arith.constant 0 : i32
    %c0_i32_1 = arith.constant 0 : i32
    return %arg0, %c0_i32, %c0_i32_0 : i32, i32, i32
  }
}

module attributes {stable_mosaic.version = 11 : i64} {
  func.func @_pool_kernel(%arg0: i32, %arg1: memref<1x16x16xf32, #tpu.memory_space<vmem>>, %arg2: memref<1x16x32xf32, #tpu.memory_space<vmem>>, %arg3: memref<1x1x16xf32, #tpu.memory_space<vmem>>, %arg4: memref<1x12x1xi32, #tpu.memory_space<vmem>>, %arg5: memref<1x12x1xf32, #tpu.memory_space<vmem>>, %arg6: memref<1x12x32xf32, #tpu.memory_space<vmem>>, %arg7: memref<1x12x12xf32, #tpu.memory_space<vmem>>) attributes {dimension_semantics = [#tpu.dimension_semantics<parallel>], iteration_bounds = array<i64: 2>, scalar_prefetch = 0 : i64, scratch_operands = 0 : i64, tpu.core_type = #tpu.core_type<tc>, window_params = [{transform_indices = @transform_0, window_bounds = array<i64: 1, 16, 16>}, {transform_indices = @transform_1, window_bounds = array<i64: 1, 16, 32>}, {transform_indices = @transform_2, window_bounds = array<i64: 1, 1, 16>}, {transform_indices = @transform_3, window_bounds = array<i64: 1, 12, 1>}, {transform_indices = @transform_4, window_bounds = array<i64: 1, 12, 1>}, {transform_indices = @transform_5, window_bounds = array<i64: 1, 12, 32>}, {transform_indices = @transform_6, window_bounds = array<i64: 1, 12, 12>}]} {
    %c0 = arith.constant 0 : index
    %c0_0 = arith.constant 0 : index
    %c0_1 = arith.constant 0 : index
    %0 = vector.load %arg1[%c0, %c0_0, %c0_1] : memref<1x16x16xf32, #tpu.memory_space<vmem>>, vector<1x16x16xf32>
    %c0_2 = arith.constant 0 : index
    %c0_3 = arith.constant 0 : index
    %c0_4 = arith.constant 0 : index
    %1 = vector.load %arg2[%c0_2, %c0_3, %c0_4] : memref<1x16x32xf32, #tpu.memory_space<vmem>>, vector<1x16x32xf32>
    %c0_5 = arith.constant 0 : index
    %c0_6 = arith.constant 0 : index
    %c0_7 = arith.constant 0 : index
    %2 = vector.load %arg3[%c0_5, %c0_6, %c0_7] : memref<1x1x16xf32, #tpu.memory_space<vmem>>, vector<1x1x16xf32>
    %c0_8 = arith.constant 0 : index
    %c0_9 = arith.constant 0 : index
    %c0_10 = arith.constant 0 : index
    %3 = vector.load %arg4[%c0_8, %c0_9, %c0_10] : memref<1x12x1xi32, #tpu.memory_space<vmem>>, vector<1x12x1xi32>
    %c0_11 = arith.constant 0 : index
    %c0_12 = arith.constant 0 : index
    %c0_13 = arith.constant 0 : index
    %4 = vector.load %arg5[%c0_11, %c0_12, %c0_13] : memref<1x12x1xf32, #tpu.memory_space<vmem>>, vector<1x12x1xf32>
    %5 = tpu.iota {dimensions = array<i32: 2>} : vector<1x12x16xi32>
    %6 = vector.broadcast %3 : vector<1x12x1xi32> to vector<1x12x16xi32>
    %7 = arith.cmpi eq, %5, %6 : vector<1x12x16xi32>
    %cst = arith.constant 1.000000e+00 : f32
    %cst_14 = arith.constant 0.000000e+00 : f32
    %8 = vector.broadcast %cst : f32 to vector<1x12x16xf32>
    %9 = vector.broadcast %cst_14 : f32 to vector<1x12x16xf32>
    %10 = arith.select %7, %8, %9 : vector<1x12x16xi1>, vector<1x12x16xf32>
    %11 = vector.broadcast %4 : vector<1x12x1xf32> to vector<1x12x16xf32>
    %12 = arith.mulf %10, %11 : vector<1x12x16xf32>
    "tpu.trace_start"() <{level = 10 : i32, message = "bkn,bnm->bkm"}> : () -> ()
    %cst_15 = arith.constant dense<0.000000e+00> : vector<1x12x16xf32>
    %13 = tpu.matmul %12, %0, %cst_15 {dimension_numbers = #tpu.dot_dimension_numbers<[2], [1], [1], [2], [0, 0, 0, 1, 1, 2], [0], [0]>} : vector<1x12x16xf32>, vector<1x16x16xf32>, vector<1x12x16xf32> -> vector<1x12x16xf32>
    "tpu.trace_stop"() : () -> ()
    %cst_16 = arith.constant dense<0.000000e+00> : vector<1x16xf32>
    %14 = vector.multi_reduction <add>, %13, %cst_16 [1] : vector<1x12x16xf32> to vector<1x16xf32>
    %15 = vector.shape_cast %14 : vector<1x16xf32> to vector<1x1x16xf32>
    %cst_17 = arith.constant 1.000000e-10 : f32
    %16 = vector.broadcast %cst_17 : f32 to vector<1x1x16xf32>
    %17 = arith.addf %15, %16 : vector<1x1x16xf32>
    %18 = tpu.reciprocal %17 {approx = true} : vector<1x1x16xf32> -> vector<1x1x16xf32>
    %19 = vector.broadcast %18 : vector<1x1x16xf32> to vector<1x12x16xf32>
    %20 = arith.mulf %13, %19 : vector<1x12x16xf32>
    %21 = vector.broadcast %2 : vector<1x1x16xf32> to vector<1x12x16xf32>
    %22 = arith.mulf %20, %21 : vector<1x12x16xf32>
    "tpu.trace_start"() <{level = 10 : i32, message = "bkn,bnd->bkd"}> : () -> ()
    %cst_18 = arith.constant dense<0.000000e+00> : vector<1x12x32xf32>
    %23 = tpu.matmul %22, %1, %cst_18 {dimension_numbers = #tpu.dot_dimension_numbers<[2], [1], [1], [2], [0, 0, 0, 1, 1, 2], [0], [0]>} : vector<1x12x16xf32>, vector<1x16x32xf32>, vector<1x12x32xf32> -> vector<1x12x32xf32>
    "tpu.trace_stop"() : () -> ()
    %c0_19 = arith.constant 0 : index
    %c0_20 = arith.constant 0 : index
    %c0_21 = arith.constant 0 : index
    %24 = vector.load %arg6[%c0_19, %c0_20, %c0_21] : memref<1x12x32xf32, #tpu.memory_space<vmem>>, vector<1x12x32xf32>
    tpu.vector_store %arg6[%c0_19, %c0_20, %c0_21], %23 {strides = array<i32>} : memref<1x12x32xf32, #tpu.memory_space<vmem>>, vector<1x12x32xf32>,
    "tpu.trace_start"() <{level = 10 : i32, message = "bkn,bnm->bkm"}> : () -> ()
    %cst_22 = arith.constant dense<0.000000e+00> : vector<1x12x16xf32>
    %25 = tpu.matmul %20, %0, %cst_22 {dimension_numbers = #tpu.dot_dimension_numbers<[2], [1], [1], [2], [0, 0, 0, 1, 1, 2], [0], [0]>} : vector<1x12x16xf32>, vector<1x16x16xf32>, vector<1x12x16xf32> -> vector<1x12x16xf32>
    "tpu.trace_stop"() : () -> ()
    "tpu.trace_start"() <{level = 10 : i32, message = "bkm,bjm->bkj"}> : () -> ()
    %cst_23 = arith.constant dense<0.000000e+00> : vector<1x12x12xf32>
    %26 = tpu.matmul %25, %20, %cst_23 {dimension_numbers = #tpu.dot_dimension_numbers<[2], [2], [1], [1], [0, 0, 0, 1, 1, 1], [0], [0]>} : vector<1x12x16xf32>, vector<1x12x16xf32>, vector<1x12x12xf32> -> vector<1x12x12xf32>
    "tpu.trace_stop"() : () -> ()
    %c0_24 = arith.constant 0 : index
    %c0_25 = arith.constant 0 : index
    %c0_26 = arith.constant 0 : index
    %27 = vector.load %arg7[%c0_24, %c0_25, %c0_26] : memref<1x12x12xf32, #tpu.memory_space<vmem>>, vector<1x12x12xf32>
    tpu.vector_store %arg7[%c0_24, %c0_25, %c0_26], %26 {strides = array<i32>} : memref<1x12x12xf32, #tpu.memory_space<vmem>>, vector<1x12x12xf32>,
    return
  }
  func.func @transform_0(%arg0: i32) -> (i32, i32, i32) {
    %c0_i32 = arith.constant 0 : i32
    %c0_i32_0 = arith.constant 0 : i32
    %c0_i32_1 = arith.constant 0 : i32
    return %arg0, %c0_i32, %c0_i32_0 : i32, i32, i32
  }
  func.func @transform_1(%arg0: i32) -> (i32, i32, i32) {
    %c0_i32 = arith.constant 0 : i32
    %c0_i32_0 = arith.constant 0 : i32
    %c0_i32_1 = arith.constant 0 : i32
    return %arg0, %c0_i32, %c0_i32_0 : i32, i32, i32
  }
  func.func @transform_2(%arg0: i32) -> (i32, i32, i32) {
    %c0_i32 = arith.constant 0 : i32
    %c0_i32_0 = arith.constant 0 : i32
    %c0_i32_1 = arith.constant 0 : i32
    return %arg0, %c0_i32, %c0_i32_0 : i32, i32, i32
  }
  func.func @transform_3(%arg0: i32) -> (i32, i32, i32) {
    %c0_i32 = arith.constant 0 : i32
    %c0_i32_0 = arith.constant 0 : i32
    %c0_i32_1 = arith.constant 0 : i32
    return %arg0, %c0_i32, %c0_i32_0 : i32, i32, i32
  }
  func.func @transform_4(%arg0: i32) -> (i32, i32, i32) {
    %c0_i32 = arith.constant 0 : i32
    %c0_i32_0 = arith.constant 0 : i32
    %c0_i32_1 = arith.constant 0 : i32
    return %arg0, %c0_i32, %c0_i32_0 : i32, i32, i32
  }
  func.func @transform_5(%arg0: i32) -> (i32, i32, i32) {
    %c0_i32 = arith.constant 0 : i32
    %c0_i32_0 = arith.constant 0 : i32
    %c0_i32_1 = arith.constant 0 : i32
    return %arg0, %c0_i32, %c0_i32_0 : i32, i32, i32
  }
  func.func @transform_6(%arg0: i32) -> (i32, i32, i32) {
    %c0_i32 = arith.constant 0 : i32
    %c0_i32_0 = arith.constant 0 : i32
    %c0_i32_1 = arith.constant 0 : i32
    return %arg0, %c0_i32, %c0_i32_0 : i32, i32, i32
  }
}

</mosaic_0001>

<bundles_post_ra>
// kernel: agcn_forward.2
= control target key start
LH: loop header
LB: loop body
LE: loop exit
PB: predicated region body
PF: predicated region fallthrough
CT: control target
= control target key end

     0   :  { %s1717_s0 = inlined_call_operand.vmem [shape: f32[2,16,16], index: 0, kind: input, shape index: {}]   ;;  %s1718_s1 = inlined_call_operand.vmem [shape: f32[2,16,32], index: 1, kind: input, shape index: {}]   ;;  %s1719_s2 = inlined_call_operand.vmem [shape: f32[2,16,1], index: 2, kind: input, shape index: {}]   ;;  %s1720_s3 = inlined_call_operand.vmem [shape: f32[2,1,16], index: 3, kind: input, shape index: {}]   ;;  %s1721_s4 = inlined_call_operand.vmem [shape: f32[2,1,16], index: 4, kind: input, shape index: {}]   ;;  %s1722_s5 = inlined_call_operand.vmem [shape: f32[2,1,16], index: 5, kind: input, shape index: {}]   ;;  %s1723_s6 = inlined_call_operand.vmem [shape: f32[32,32], index: 6, kind: input, shape index: {}]   ;;  %s1724_s7 = inlined_call_operand.vmem [shape: f32[1,32], index: 7, kind: input, shape index: {}]   ;;  %s1725_s8 = inlined_call_operand.vmem [shape: f32[1,32], index: 8, kind: input, shape index: {}]   ;;  %s1726_s9 = inlined_call_operand.vmem [shape: f32[1,32], index: 9, kind: input, shape index: {}]   ;;  %s1727_s10 = inlined_call_operand.<no memory space> [shape: f32[1,1], index: 10, kind: input, shape index: {}]   ;;  %s1728_s11 = inlined_call_operand.vmem [shape: f32[2,16,32], index: 11, kind: output, shape index: {0}]   ;;  %s1729_s12 = inlined_call_operand.vmem [shape: f32[2,1,16], index: 12, kind: output, shape index: {1}]   ;;  %s1730_s13 = inlined_call_operand.hbm [shape: f32[2,1,32], index: 13, kind: output, shape index: {2}]  }
   0x1   :  { %1731 = sst [smem:[#allocation6_spill]] %s1717_s0 }
   0x2   :  { %1732 = sst [smem:[#allocation7_spill]] %s1718_s1 }
   0x3   :  { %1733 = sst [smem:[#allocation8_spill]] %s1719_s2 }
   0x4   :  { %1734 = sst [smem:[#allocation9_spill]] %s1720_s3 }
   0x5   :  { %19 = sst [smem:[#allocation2]] %s1727_s10 }
   0x6   :  { %20 = vsyncpa [#allocation4], 0 }
   0x7   :  { %22 = vsyncpa [#allocation4 + $0x1], 0  ;;  %s1548_s27 = smov 0   ;;  %s1550_s28 = smov 0  }
   0x8   :  { %s1552_s29 = smov 0   ;;  %s1554_s30 = smov 0  }
   0x9 LB: > { %s1569_s10 = sadd.s32 4294967295, %s1469_s30   ;;  %s1256_s14 = sadd.s32 4294967294, %s1469_s30   ;;  %s1469_s30 = sphi %s1554_s30, %s1744_s30   ;;  %s1465_s29 = sphi %s1552_s29, %s1743_s29   ;;  %s1461_s28 = sphi %s1550_s28, %s1742_s28   ;;  %s1457_s27 = sphi %s1548_s27, %s1741_s27  }
   0xa   : > { %s1573_s15 = sadd.s32 1, %s1469_s30   ;;  %s348_s16 = sadd.s32 1, %s1465_s29 }
   0xb   : > { %s345_s17 = ssub.s32 %s1469_s30, %s1573_s15  ;;  %p358_p0 = scmp.ne.s32.totalorder %s1465_s29, %s1461_s28 }
   0xc   : > { %p346_p1 = scmp.eq.s32.totalorder %s345_s17, 0  ;;  %p359_p2 = scmp.eq.s32.totalorder %s1569_s10, 1 }
   0xd   : > { %p364_p3 = scmp.ne.s32.totalorder %s1461_s28, %s1457_s27  ;;  %p365_p4 = scmp.eq.s32.totalorder %s1256_s14, 1 }
   0xe   : > { %s1584_s18 = scalar_select %p346_p1, %s1465_s29, %s348_s16  }
   0xf   : > { %p1586_p5 = por %p359_p2, %p358_p0  ;;  %p1590_p6 = por %p365_p4, %p364_p3 }
  0x10   : > { %p1259_p7 = scmp.ge.s32.totalorder %s1469_s30, 1  ;;  %p440_p8 = scmp.lt.s32.totalorder %s1469_s30, 3 }
  0x12   : > { %p441_p9 = pnand %p1259_p7, %p440_p8 }
  0x13   : > { %p510_p10 = scmp.lt.s32.totalorder (!%p441_p9), %s1569_s10, 1  ;;  %s1737_s1 = sld [smem:[#allocation7_spill]] (!%p441_p9) }
  0x14   : > { %444 = sbr.rel (%p441_p9) target bundleno = 1207 (0x4b7), region = 64  ;;  %s1738_s0 = sld [smem:[#allocation6_spill]] (!%p441_p9) }
  0x15   : > { %s1739_s2 = sld [smem:[#allocation8_spill]] (!%p441_p9) }
  0x16   : > { %s1740_s3 = sld [smem:[#allocation9_spill]] (!%p441_p9) }
  0x17   : > { %s910_s23 = sld [smem:[#allocation2]] (!%p441_p9) }
  0x19   : > { %s1598_s21 = scalar_select %p510_p10, %s1569_s10, 1  ;;  %vm556_vm0 = vcmask 130048   ;;  %v718_v4 = vld [vmem:[%s1723_s6 + $0x18] sm:$0xff]  ;;  %v717_v5 = vld [vmem:[%s1723_s6 + $0x10] sm:$0xff]  ;;  %v1268_v6 = vld [vmem:[%s1724_s7] ss:$0 sm:$0xff] }
  0x1a   : > { %v716_v13 = vld [vmem:[%s1723_s6 + $0x8] sm:$0xff]  ;;  %v715_v14 = vld [vmem:[%s1723_s6] sm:$0xff]  ;;  %v1471_v15 = vmov 0   ;;  %vm726_vm1 = vcmask 261120   ;;  %v1472_v20 = vmov 0.0   ;;  %vm1473_vm2 = vmmov 0  }
  0x1b   : > { %s1601_s22 = sshll.u32 %s1598_s21, 4  ;;  %1402 = vset.pattern.permute.xlu0 %v1471_v15  ;;  %v1273_v21 = vld [vmem:[%s1725_s8] ss:$0 sm:$0xff]  ;;  %vm906_vm3 = vcmask 122880   ;;  %vm1077_vm4 = vcmask 253952  }
  0x1c   : > { %s519_s25 = scalar_lea.vmem %s1737_s1, %s1601_s22  ;;  %s514_s16 = scalar_lea.vmem %s1738_s0, %s1601_s22  ;;  %v824_v32 = vld [vmem:[%s1726_s9] sm:$0x1] }
  0x1d   : > { %v549_v0 = vld [vmem:[%s519_s25 + $0x8] sm:$0xff]  ;;  %v548_v1 = vld [vmem:[%s519_s25] sm:$0xff]  ;;  %s524_s14 = scalar_lea.vmem %s1739_s2, %s1601_s22  ;;  %s538_s26 = scalar_lea.vmem %s1728_s11, %s1601_s22 }
  0x1e   : > { %v542_v2 = vld [vmem:[%s514_s16] sm:$0xff]  ;;  %1314 = vmatprep.subr.mxu0 %v549_v0  ;;  %v543_v3 = vld [vmem:[%s514_s16 + $0x8] sm:$0xff]  ;;  %s527_s17 = scalar_lea.vmem %s1740_s3, %s1598_s21  ;;  %s911_s24 = sand.u32 2147483647, %s910_s23 }
  0x1f   : > { %1318 = vmatprep.mubr.msk.f32.mxu0 %vm556_vm0, %v542_v2  ;;  %1315 = vmatpush3.msra.mxu0 %v549_v0  ;;  %v546_v16 = vld [vmem:[%s524_s14 + $0x8] sm:$0xff]  ;;  %v545_v17 = vld [vmem:[%s524_s14] sm:$0xff]  ;;  %v913_v41 = vstv %s911_s24  ;;  %s1284_s25 = sshll.u32 %s1569_s10, 4  ;;  %s1474_s1 = smov [#allocation3]  }
  0x20   : > { %1325 = vmatprep.mubr.msk.f32.mxu1 %vm556_vm0, %v542_v2  ;;  %1316 = vmatprep.subr.mxu0 %v548_v1  ;;  %v1660_v33 = vld [vmem:[%s527_s17] sm:$0x1]  ;;  %s1104_s23 = scalar_lea.hbm %s1730_s13, %s1284_s25  ;;  %s1413_s2 = sshll.u32 %s1474_s1, 4  ;;  %s1414_s2 = int_to_ptr.vmem [resolvable:$false] %s1413_s2 }
  0x21   : > { %1317 = vmatpush3.msra.mxu0 %v548_v1  ;;  %817 = vperm.xlu0 %1402, %v546_v16   ;;  %v1276_v34 = vadd.f32 -1.0, %v1660_v33  ;;  %v1071_v40 = vsel %vm906_vm3, %v1660_v33, 0.0  ;;  %s1415_s3 = scalar_lea.vmem %s1414_s2, 32 }
  0x22   : > { %1319 = vmatmul.mubr.msk.f32.vlgmr.msra.gmra.mxu0 %vm556_vm0, %v543_v3  ;;  %1328 = vmatprep.subr.mxu0 %v718_v4 }
  0x23   : > { %1329 = vmatpush3.msra.mxu0 %v718_v4  ;;  %v826_v35 = vmul.f32 1e+10, %v1276_v34 }
  0x24   : > { %1330 = vmatprep.subr.mxu0 %v717_v5 }
  0x25   : > { %1331 = vmatpush3.msra.mxu0 %v717_v5  ;;  %812 = vperm.xlu0 %1402, %v545_v17  }
  0x26   : > { %1332 = vmatprep.subr.mxu0 %v716_v13 }
  0x27   : > { %1333 = vmatpush3.msra.mxu0 %v716_v13 }
  0x28   : > { %1334 = vmatprep.subr.mxu0 %v715_v14 }
  0x29   : > { %1335 = vmatpush3.msra.mxu0 %v715_v14 }
  0x2a   : > { %1346 = vmatprep.subr.mxu0 %v1472_v20 }
  0x9c   : > { %v818_v22 = vpop.permute.xlu0 %817 }
  0xa0   : > { %v813_v30 = vpop.permute.xlu0 %812 }
  0xe2   : > { %v1320_v7 = vpop.f32.mrf.mxu0 }
  0xe3   : > { %v635_v8 = vadd.f32 %v1320_v7, %v1268_v6 }
  0xe4   : > { %v629_v9 = vpop.f32.mrf.mxu0 }
  0xe5   : > { %v639_v10 = vmax.f32 %v635_v8, 0.0  ;;  %v630_v11 = vadd.f32 %v1268_v6, %v629_v9 }
  0xe7   : > { %v638_v12 = vmax.f32 %v630_v11, 0.0  ;;  %1321 = vmatprep.subr.mxu1 %v639_v10 }
  0xe8   : > { %1322 = vmatpush3.msra.mxu1 %v639_v10 }
  0xe9   : > { %1323 = vmatprep.subr.mxu1 %v638_v12 }
  0xea   : > { %1324 = vmatpush3.msra.mxu1 %v638_v12 }
  0xeb   : > { %1326 = vmatmul.mubr.msk.f32.vlgmr.msra.gmra.mxu1 %vm556_vm0, %v543_v3  ;;  %1339 = vmatprep.subr.mxu1 %v1472_v20 }
  0xec   : > { %1343 = vmatprep.mubr.msk.f32.mxu1 %vm1473_vm2, %v1472_v20 }
 0x1ab   : > { %v1327_v18 = vpop.f32.mrf.mxu1 }
 0x1ad   : > { %v706_v19 = vpop.f32.mrf.mxu1 }
 0x1ae   : > { %1336 = vmatprep.mubr.msk.f32.mxu0 %vm726_vm1, %v706_v19 }
 0x1af   : > { %1337 = vmatmul.mubr.msk.f32.vlgmr.msra.gmra.mxu0 %vm726_vm1, %v1327_v18 }
 0x1b0   : > { %1347 = vmatpush3.xpose.msk.msra.mxu0 %vm556_vm0, %v543_v3  ;;  %1350 = vmatprep.mubr.msk.f32.mxu0 %vm1473_vm2, %v1472_v20 }
 0x1b1   : > { %1348 = vmatprep.subr.mxu0 %v1472_v20 }
 0x1b4   : > { %1349 = vmatpush3.xpose.msk.msra.mxu0 %vm556_vm0, %v542_v2 }
 0x26f   : > { %v1338_v23 = vpop.f32.mrf.mxu0 }
 0x270   : > { %v805_v24 = vadd.f32 %v1338_v23, %v1273_v21 }
 0x271   : > { %v799_v25 = vpop.f32.mrf.mxu0 }
 0x272   : > { %v809_v26 = vmax.f32 %v805_v24, 0.0  ;;  %v800_v27 = vadd.f32 %v1273_v21, %v799_v25 }
 0x274   : > { %v821_v28 = vmul.f32 %v818_v22, %v809_v26  ;;  %v808_v29 = vmax.f32 %v800_v27, 0.0 }
 0x276   : > { %v820_v31 = vmul.f32 %v813_v30, %v808_v29  ;;  %823 = vst.msk [vmem:[%s538_s26 + $0x8] sm:$0xff] %vm726_vm1, %v821_v28  ;;  %1340 = vmatpush3.xpose.msk.msra.mxu1 %vm726_vm1, %v821_v28 }
 0x277   : > { %1341 = vmatprep.subr.mxu1 %v1472_v20 }
 0x278   : > { %822 = vst.msk [vmem:[%s538_s26] sm:$0xff] %vm726_vm1, %v820_v31  ;;  %s508_s26 = sand.u32 1, %s1461_s28  }
 0x279   : > { %s509_s14 = scalar_lea.vmem [#allocation3], %s508_s26  ;;  %s1088_s24 = scalar_lea.sflag [#allocation4], %s508_s26 }
 0x27a   : > { %1342 = vmatpush3.xpose.msk.msra.mxu1 %vm726_vm1, %v820_v31  ;;  %s1106_s22 = sshll.u32 %s509_s14, 4  ;;  %s1107_s22 = int_to_ptr.vmem [resolvable:$true] %s1106_s22 }
 0x27b   : > { %1353 = vmatprep.subr.mxu1 %v1472_v20  ;;  %s1409_s0 = scalar_lea.vmem %s1107_s22, 16  ;;  %p1416_p0 = scmp.lt.s32.totalorder %s1107_s22, %s1414_s2 }
 0x27c   : > { %p1410_p11 = scmp.ne.s32.totalorder %s1107_s22, %s1409_s0  ;;  %p1417_p1 = scmp.lt.s32.totalorder %s1415_s3, %s1409_s0 }
 0x27d   : > { %1344 = vmatmul.mubr.msk.f32.vlgmr.msra.gmra.mxu1 %vm726_vm1, %v824_v32 }
 0x27e   : > { %1354 = vmatpush3.msra.mxu1 %v809_v26  ;;  %1357 = vmatprep.mubr.msk.f32.mxu1 %vm1473_vm2, %v1472_v20  ;;  %p1411_p12 = pnand %p1410_p11, %p1586_p5  ;;  %p1418_p2 = por %p1417_p1, %p1416_p0 }
 0x27f   : > { %1355 = vmatprep.subr.mxu1 %v1472_v20 }
 0x280   : > { %1356 = vmatpush3.msra.mxu1 %v808_v29  ;;  %p1412_p13 = pneg %p1411_p12 }
 0x281   : > { %1358 = vmatmul.mubr.msk.f32.vlgmr.msra.gmra.mxu1 %vm556_vm0, %v1660_v33 }
 0x282   : > { %p1419_p3 = pnand %p1418_p2, %p1412_p13 }
 0x33d   : > { %v902_v36 = vpop.f32.mrf.mxu1 }
 0x33e   : > { %v903_v37 = vadd.f32 %v902_v36, %v826_v35 }
 0x33f   : > { %v1345_v38 = vpop.f32.mrf.mxu1 }
 0x340   : > { %v907_v39 = vsel %vm906_vm3, %v903_v37, -inf }
 0x341   : > { %908 = vmax.xlane.f32.xlu1 %v907_v39  ;;  %v1067_v49 = vpop.f32.mrf.mxu1 }
 0x343   : > { %v1359_v51 = vpop.f32.mrf.mxu1 }
 0x345   : > { %1072 = vadd.xlane.f32.xlu1 %v1071_v40 }
 0x3ca   : > { %v909_v42 = vpop.xlane.xlu1 %908 }
 0x3cb   : > { %v912_v43 = vsub.f32 %v903_v37, %v909_v42 }
 0x3cd   : > { %v914_v44 = vmul.f32 %v913_v41, %v912_v43 }
 0x3ce   : > { %v1073_v47 = vpop.xlane.xlu1 %1072 }
 0x3cf   : > { %v915_v45 = vmul.f32 1.442695, %v914_v44  ;;  %v1074_v48 = vadd.f32 1e-10, %v1073_v47 }
 0x3d1   : > { %1403 = vpow2.f32 %v915_v45 }
 0x3d2   : > { %1405 = vrcp.f32 %v1074_v48 }
 0x3de   : > { %v1404_v46 = vpop.eup %1403 }
 0x3df   : > { %1351 = vmatmul.mubr.msk.f32.vlgmr.msra.gmra.mxu0 %vm556_vm0, %v1404_v46  ;;  %v1406_v50 = vpop.eup %1405 }
 0x3e0   : > { %v1076_v52 = vmul.f32 %v1406_v50, %v1067_v49 }
 0x3e2   : > { %1078 = vst.msk [vmem:[%s509_s14] sm:$0x1] %vm1077_vm4, %v1076_v52 }
 0x3e3   : > { %1422 = shalt.err (!%p1419_p3)
}
 0x3e4   : > { %s1423_s10 = scalar_lea.hbm %s1104_s23, 16  ;;  %s1427_s14 = scalar_lea.hbm %s1730_s13, 32 }
 0x3e5   : > { %p1424_p4 = scmp.ne.s32.totalorder %s1104_s23, %s1423_s10  ;;  %p1428_p9 = scmp.lt.s32.totalorder %s1104_s23, %s1730_s13 }
 0x3e6   : > { %p1429_p10 = scmp.lt.s32.totalorder %s1427_s14, %s1423_s10 }
 0x3e7   : > { %p1425_p7 = pnand %p1424_p4, %p1586_p5 }
 0x3e8   : > { %p1430_p11 = por %p1429_p10, %p1428_p9 }
 0x3e9   : > { %p1426_p8 = pneg %p1425_p7 }
 0x3eb   : > { %p1431_p12 = pnand %p1430_p11, %p1426_p8 }
 0x3ed   : > { %1434 = shalt.err (!%p1431_p12)
}
 0x3ee   : > { %1360 = dma.vmem_to_hbm [thread:$0]  (%p1586_p5), %s1107_s22, 16, %s1104_s23, %s1088_s24  }
 0x3ef   : > { %s530_s2 = scalar_lea.vmem %s1721_s4, %s1598_s21  ;;  %s533_s26 = scalar_lea.vmem %s1722_s5, %s1598_s21 }
 0x3f0   : > { %v990_v56 = vld [vmem:[%s530_s2] sm:$0x1]  ;;  %s541_s23 = scalar_lea.vmem %s1729_s12, %s1598_s21 }
 0x3f1   : > { %v991_v57 = vmul.f32 %v1404_v46, %v990_v56  ;;  %v994_v59 = vld [vmem:[%s533_s26] sm:$0x1] }
 0x49f   : > { %v986_v53 = vpop.f32.mrf.mxu0 }
 0x4a0   : > { %v987_v54 = vadd.f32 1e-10, %v986_v53 }
 0x4a1   : > { %v1352_v55 = vpop.f32.mrf.mxu0 }
 0x4a2   : > { %1407 = vrcp.f32 %v987_v54 }
 0x4af   : > { %v1408_v58 = vpop.eup %1407 }
 0x4b0   : > { %v993_v60 = vmul.f32 %v1408_v58, %v991_v57 }
 0x4b2   : > { %v995_v61 = vmul.f32 %v994_v59, %v993_v60 }
 0x4b4   : > { %v996_v62 = vmul.f32 %v995_v61, %v1660_v33 }
 0x4b6   : > { %997 = vst.msk [vmem:[%s541_s23] sm:$0x1] %vm906_vm3, %v996_v62 }
 0x4b7 PF: > { %p1366_p5 = scmp.ge.s32.totalorder %s1469_s30, 2  ;;  %s1132_s24 = sand.u32 1, %s1457_s27  }
 0x4b8   : > { %s1133_s25 = scalar_lea.sflag [#allocation4], %s1132_s24 }
 0x4b9   : > { %p1363_p13 = pnand %p1366_p5, %p1590_p6 }
 0x4bb   : > { %p1364_p0 = pneg %p1363_p13 }
 0x4bd   : > { %1452 = dma.done.wait (%p1364_p0), %s1133_s25, 16  }
 0x4be   : > { %1454 = vsyncadd (%p1364_p0), %s1133_s25, 4294967280  ;;  %p25_p1 = scmp.ge.s32.totalorder %s1573_s15, 4   ;;  %s1741_s27 = smov %s1461_s28 }
 0x4bf   : > { %s1742_s28 = smov %s1465_s29  ;;  %s1743_s29 = smov %s1584_s18 }
 0x4c0   : > { %s1744_s30 = smov %s1573_s15  ;;  %27 = sbr.rel (!%p25_p1) target bundleno = 9 (0x9), region = 138 }
 0x4c5   :  { %1137 = vsyncpa [#allocation4], 1 }
 0x4c6   :  { %1139 = vsyncpa [#allocation4 + $0x1], 1 }

// kernel: agcn_forward.3
= control target key start
LH: loop header
LB: loop body
LE: loop exit
PB: predicated region body
PF: predicated region fallthrough
CT: control target
= control target key end

     0   :  { %s999_s21 = smov 0   ;;  %s1056_s0 = inlined_call_operand.vmem [shape: f32[2,16,16], index: 0, kind: input, shape index: {}]   ;;  %s1057_s1 = inlined_call_operand.vmem [shape: f32[2,16,32], index: 1, kind: input, shape index: {}]   ;;  %s1058_s2 = inlined_call_operand.vmem [shape: f32[2,1,16], index: 2, kind: input, shape index: {}]   ;;  %s1059_s3 = inlined_call_operand.vmem [shape: s32[2,12,1], index: 3, kind: input, shape index: {}]   ;;  %s1060_s4 = inlined_call_operand.vmem [shape: f32[2,12,1], index: 4, kind: input, shape index: {}]   ;;  %s1061_s5 = inlined_call_operand.vmem [shape: f32[2,12,32], index: 5, kind: output, shape index: {0}]   ;;  %s1062_s6 = inlined_call_operand.vmem [shape: f32[2,12,12], index: 6, kind: output, shape index: {1}]  }
   0x1 LB: > { %s860_s22 = sadd.s32 4294967295, %s960_s21   ;;  %p864_p0 = scmp.ge.s32.totalorder %s960_s21, 1  ;;  %s960_s21 = sphi %s999_s21, %s17_s21  }
   0x2   : > { %p253_p1 = scmp.lt.s32.totalorder %s960_s21, 3 }
   0x4   : > { %p254_p2 = pnand %p864_p0, %p253_p1 }
   0x5   : > { %p306_p3 = scmp.lt.s32.totalorder (!%p254_p2), %s860_s22, 1 }
   0x6   : > { %257 = sbr.rel (%p254_p2) target bundleno = 769 (0x301), region = 40 }
   0xb   : > { %v962_v0 = vmov 0   ;;  %s1064_s22 = smov (!%p306_p3, %s860_s22), 1  ;;  %v348_v7 = vlaneseq  ;;  %v963_v11 = vmov 0.0   ;;  %vm372_vm1 = vcmask 130048  }
   0xc   : > { %951 = vset.pattern.permute.xlu1 %v962_v0  ;;  %950 = vset.pattern.permute.xlu0 %v962_v0  ;;  %s1010_s23 = sshll.u32 %s1064_s22, 4  ;;  %vm455_vm3 = vcmask 125952   ;;  %s318_s14 = scalar_lea.vmem %s1058_s2, %s1064_s22  ;;  %vm559_vm4 = vcmask 257024   ;;  %vm557_vm5 = vcmask 261120   ;;  %vm725_vm6 = vcmask 93184  }
   0xd   : > { %s328_s26 = scalar_lea.vmem %s1060_s4, %s1010_s23  ;;  %s323_s29 = scalar_lea.vmem %s1059_s3, %s1010_s23  ;;  %v349_v8 = vand.u32 127, %v348_v7  ;;  %v879_v33 = vld [vmem:[%s318_s14] ss:$0 sm:$0xff]  ;;  %vm723_vm7 = vcmask 97280  }
   0xe   : > { %v346_v1 = vld [vmem:[%s328_s26] sm:$0xff]  ;;  %s310_s8 = scalar_lea.vmem %s1056_s0, %s1010_s23  ;;  %v347_v4 = vld [vmem:[%s328_s26 + $0x8] sm:$0xf]  ;;  %s315_s11 = scalar_lea.vmem %s1057_s1, %s1010_s23 }
   0xf   : > { %v344_v2 = vld [vmem:[%s323_s29] sm:$0xff]  ;;  %362 = vperm.xlu1 %951, %v346_v1   ;;  %v340_v3 = vld [vmem:[%s310_s8 + $0x8] sm:$0xff]  ;;  %s333_s17 = scalar_lea.vmem %s1061_s5, %s1010_s23  ;;  %s338_s20 = scalar_lea.vmem %s1062_s6, %s1010_s23 }
  0x10   : > { %351 = vperm.xlu0 %950, %v344_v2   ;;  %v345_v5 = vld [vmem:[%s323_s29 + $0x8] sm:$0xf]  ;;  %912 = vmatprep.subr.mxu0 %v340_v3  ;;  %v339_v6 = vld [vmem:[%s310_s8] sm:$0xff] }
  0x11   : > { %913 = vmatpush3.msra.mxu0 %v340_v3  ;;  %v342_v18 = vld [vmem:[%s315_s11 + $0x8] sm:$0xff]  ;;  %v341_v19 = vld [vmem:[%s315_s11] sm:$0xff] }
  0x12   : > { %914 = vmatprep.subr.mxu0 %v339_v6  ;;  %919 = vmatprep.subr.mxu1 %v342_v18 }
  0x13   : > { %367 = vperm.xlu1 %951, %v347_v4   ;;  %915 = vmatpush3.msra.mxu0 %v339_v6 }
  0x14   : > { %354 = vperm.xlu0 %950, %v345_v5   ;;  %926 = vmatprep.subr.mxu0 %v340_v3 }
  0x15   : > { %920 = vmatpush3.msra.mxu1 %v342_v18 }
  0x16   : > { %921 = vmatprep.subr.mxu1 %v341_v19 }
  0x17   : > { %922 = vmatpush3.msra.mxu1 %v341_v19 }
  0x8a   : > { %v363_v9 = vpop.permute.xlu1 %362 }
  0x8b   : > { %v352_v10 = vpop.permute.xlu0 %351 }
  0x8c   : > { %vm356_vm0 = vcmp.eq.s32.totalorder %v349_v8, %v352_v10 }
  0x8d   : > { %v358_v12 = vsel %vm356_vm0, 1.0, %v963_v11 }
  0x8e   : > { %v370_v13 = vmul.f32 %v363_v9, %v358_v12  ;;  %v368_v15 = vpop.permute.xlu1 %367 }
  0x8f   : > { %v355_v14 = vpop.permute.xlu0 %354 }
  0x90   : > { %vm357_vm2 = vcmp.eq.s32.totalorder %v349_v8, %v355_v14  ;;  %916 = vmatprep.mubr.msk.f32.mxu0 %vm372_vm1, %v370_v13 }
  0x91   : > { %v359_v16 = vsel %vm357_vm2, 1.0, %v963_v11 }
  0x92   : > { %v371_v17 = vmul.f32 %v368_v15, %v359_v16 }
  0x94   : > { %917 = vmatmul.mubr.msk.f32.vlgmr.msra.gmra.mxu0 %vm372_vm1, %v371_v17 }
  0x95   : > { %927 = vmatpush3.msra.mxu0 %v340_v3 }
  0x96   : > { %928 = vmatprep.subr.mxu0 %v339_v6 }
  0x97   : > { %929 = vmatpush3.msra.mxu0 %v339_v6 }
 0x154   : > { %v918_v20 = vpop.f32.mrf.mxu0 }
 0x155   : > { %v456_v22 = vsel %vm455_vm3, %v918_v20, 0.0 }
 0x156   : > { %v445_v21 = vpop.f32.mrf.mxu0 }
 0x157   : > { %v454_v23 = vsel %vm372_vm1, %v445_v21, 0.0 }
 0x158   : > { %v457_v24 = vadd.f32 %v456_v22, %v454_v23 }
 0x15a   : > { %v458_v25 = vrot.slane %v457_v24, 4 }
 0x15c   : > { %v459_v26 = vadd.f32 %v458_v25, %v457_v24 }
 0x15e   : > { %v460_v27 = vrot.slane %v459_v26, 2 }
 0x160   : > { %v461_v28 = vadd.f32 %v460_v27, %v459_v26 }
 0x162   : > { %v462_v29 = vrot.slane %v461_v28, 1 }
 0x164   : > { %v463_v30 = vadd.f32 %v462_v29, %v461_v28 }
 0x166   : > { %v464_v31 = vadd.f32 1e-10, %v463_v30 }
 0x168   : > { %952 = vrcp.f32 %v464_v31 }
 0x175   : > { %v953_v32 = vpop.eup %952 }
 0x176   : > { %v466_v34 = vmul.f32 %v953_v32, %v445_v21  ;;  %v467_v35 = vmul.f32 %v953_v32, %v918_v20 }
 0x178   : > { %930 = vmatprep.mubr.msk.f32.mxu0 %vm372_vm1, %v466_v34  ;;  %933 = vmatprep.subr.msk.mxu1 %vm372_vm1, %v467_v35  ;;  %v474_v36 = vmul.f32 %v879_v33, %v466_v34  ;;  %v475_v37 = vmul.f32 %v879_v33, %v467_v35 }
 0x179   : > { %931 = vmatmul.mubr.msk.f32.vlgmr.msra.gmra.mxu0 %vm372_vm1, %v467_v35 }
 0x17a   : > { %923 = vmatprep.mubr.msk.f32.mxu1 %vm372_vm1, %v474_v36 }
 0x17b   : > { %924 = vmatmul.mubr.msk.f32.vlgmr.msra.gmra.mxu1 %vm372_vm1, %v475_v37 }
 0x17c   : > { %934 = vmatpush3.xpose.msk.msra.mxu1 %vm372_vm1, %v467_v35 }
 0x17d   : > { %935 = vmatprep.subr.msk.mxu1 %vm372_vm1, %v466_v34 }
 0x180   : > { %936 = vmatpush3.xpose.msk.msra.mxu1 %vm372_vm1, %v466_v34 }
 0x239   : > { %v932_v38 = vpop.f32.mrf.mxu0 }
 0x23b   : > { %v925_v39 = vpop.f32.mrf.mxu1  ;;  %v633_v40 = vpop.f32.mrf.mxu0 }
 0x23c   : > { %560 = vst.msk [vmem:[%s333_s17 + $0x8] sm:$0xf] %vm559_vm4, %v925_v39  ;;  %937 = vmatprep.mubr.msk.f32.mxu1 %vm372_vm1, %v633_v40 }
 0x23d   : > { %v548_v41 = vpop.f32.mrf.mxu1  ;;  %938 = vmatmul.mubr.msk.f32.vlgmr.msra.gmra.mxu1 %vm372_vm1, %v932_v38 }
 0x23e   : > { %558 = vst.msk [vmem:[%s333_s17] sm:$0xff] %vm557_vm5, %v548_v41 }
 0x2fd   : > { %v939_v42 = vpop.f32.mrf.mxu1 }
 0x2fe   : > { %726 = vst.msk [vmem:[%s338_s20 + $0x8] sm:$0xf] %vm725_vm6, %v939_v42 }
 0x2ff   : > { %v714_v43 = vpop.f32.mrf.mxu1 }
 0x300   : > { %724 = vst.msk [vmem:[%s338_s20] sm:$0xff] %vm723_vm7, %v714_v43 }
 0x301 PF: > { %s17_s21 = sadd.s32 1, %s960_s21  }
 0x302   : > { %p14_p4 = scmp.ge.s32.totalorder %s17_s21, 4  }
 0x304   :  { %16 = sbr.rel (!%p14_p4) target bundleno = 1 (0x1), region = 94 }

</bundles_post_ra>
